<compile_context>
chip_gen: v6e
topology: v6e:2x2x1
jax: 0.10.0
libtpu: 0.0.40
codegen_flags: <defaults>
</compile_context>

<pallas_src>
import numpy as np
import jax
import jax.numpy as jnp
from jax import lax
from jax.experimental import pallas as pl
from jax.experimental.pallas import tpu as pltpu

INF = 100000000          # matches the PyTorch reference
INF_F = float(INF)       # python float -> traces as a literal, never a captured constant
LANE = 128


def _pick_tile(total, cands=(2048, 1024, 512, 256, 128)):
    for c in cands:
        if total >= c and total % c == 0:
            return c
    return total


# ----------------------------------------------------------------------------
# Kernel 1: batched location -> ground-truth assignment
# ----------------------------------------------------------------------------
def _make_assign_kernel(center_sample):
    def kernel(pts_ref, gt_ref, gtT_ref, lab_ref, bt_ref, kt_ref):
        pts = pts_ref[...]                       # (8, Tn)  points on lanes
        xs = pts[0:1, :]
        ys = pts[1:2, :]
        st = pts[2:3, :]
        lo = pts[3:4, :]
        hi = pts[4:5, :]
        valid = pts[5:6, :]

        gt = gt_ref[0]                           # (G_pad, 8)  GTs on sublanes
        gtT = gtT_ref[0]                         # (8, G_pad)
        bx0 = gt[:, 0:1]                         # (G_pad, 1)
        by1 = gt[:, 1:2]
        bx2 = gt[:, 2:3]
        by3 = gt[:, 3:4]
        area = gt[:, 7:8]

        l = xs - bx0                             # (G_pad, Tn)
        t = ys - by1
        r = bx2 - xs
        b = by3 - ys

        if center_sample:
            cx = (bx0 + bx2) * 0.5               # (G_pad, 1)
            cy = (by1 + by3) * 0.5
            x_min = cx - st                      # (G_pad, Tn)
            y_min = cy - st
            x_max = cx + st
            y_max = cy + st
            cg0 = jnp.maximum(x_min, bx0)        # where(x_min > gt0, x_min, gt0)
            cg1 = jnp.maximum(y_min, by1)
            cg2 = jnp.minimum(x_max, bx2)        # where(x_max > gt2, gt2, x_max)
            cg3 = jnp.minimum(y_max, by3)
            left = xs - cg0
            right = cg2 - xs
            top = ys - cg1
            bottom = cg3 - ys
            mn = jnp.minimum(jnp.minimum(left, right), jnp.minimum(top, bottom))
            is_in = mn > 0
            # reference: if center_x[..., 0].sum() == 0 -> no positives at all
            zero_flag = cx[0:1, 0:1] == 0.0
            is_in = jnp.logical_and(is_in, jnp.logical_not(zero_flag))
        else:
            mn = jnp.minimum(jnp.minimum(l, r), jnp.minimum(t, b))
            is_in = mn > 0

        mx = jnp.maximum(jnp.maximum(l, r), jnp.maximum(t, b))
        cared = jnp.logical_and(mx >= lo, mx <= hi)

        gt_area = jnp.where(jnp.logical_and(is_in, cared), area, INF_F)   # (G_pad, Tn)
        min_area = jnp.min(gt_area, axis=0, keepdims=True)                # (1, Tn)

        g_pad = gt_area.shape[0]
        iota = lax.broadcasted_iota(jnp.int32, gt_area.shape, 0)
        cand = jnp.where(gt_area == min_area, iota, g_pad)
        gt_id = jnp.min(cand, axis=0, keepdims=True)                      # first minimal index
        onehot = (iota == gt_id).astype(jnp.float32)                      # (G_pad, Tn)

        # gather the winning GT's attributes for every point with one MXU matmul
        sel = lax.dot(gtT, onehot, precision=lax.Precision.HIGHEST,
                      preferred_element_type=jnp.float32)                 # (8, Tn)
        sx0 = sel[0:1, :]
        sy0 = sel[1:2, :]
        sx1 = sel[2:3, :]
        sy1 = sel[3:4, :]
        skx = sel[4:5, :]
        sky = sel[5:6, :]
        slab = sel[6:7, :]

        bt_ref[0:1, :] = xs - sx0
        bt_ref[1:2, :] = ys - sy0
        bt_ref[2:3, :] = sx1 - xs
        bt_ref[3:4, :] = sy1 - ys

        kt_ref[0:1, :] = skx - sx0
        kt_ref[1:2, :] = sky - sy0
        kt_ref[2:3, :] = sx1 - skx
        kt_ref[3:4, :] = sy1 - sky

        lab = (slab + 0.5).astype(jnp.int32)                              # labels are >= 0
        lab = jnp.where(min_area == INF_F, 0, lab)
        lab = jnp.where(valid > 0.0, lab, -1)                             # padded points -> ignore
        lab_ref[...] = lab

    return kernel


# ----------------------------------------------------------------------------
# Kernel 2: fused focal loss + GIoU/IoU + centerness BCE partial sums
# ----------------------------------------------------------------------------
def _make_loss_kernel(gamma, alpha, loc_loss_type):
    gamma = float(gamma)
    alpha = float(alpha)

    def _log_sigmoid(x):
        # stable log(sigmoid(x)) = min(x, 0) - log(1 + exp(-|x|))   (exp/log only)
        return jnp.minimum(x, 0.0) - jnp.log(1.0 + jnp.exp(-jnp.abs(x)))

    def _pow(x, g):
        if g == 2.0:
            return x * x
        return jnp.exp(g * jnp.log(x))

    def kernel(cls_ref, bp_ref, bt_ref, kt_ref, cp_ref, lab_ref, out_ref, fac_ref, acc_ref):
        @pl.when(pl.program_id(0) == 0)
        def _init():
            fac_ref[...] = jnp.zeros_like(fac_ref)
            acc_ref[...] = jnp.zeros_like(acc_ref)

        lab = lab_ref[...]                         # (1, Tm) int32
        x = cls_ref[...]                           # (C, Tm) f32

        # ---- sigmoid focal loss (accumulated per class x lane, reduced at the end) ----
        cid = lax.broadcasted_iota(jnp.int32, x.shape, 0) + 1
        logp = _log_sigmoid(x)                     # log(sigmoid(x))
        log1mp = logp - x                          # log(1 - sigmoid(x)) = log_sigmoid(-x)
        p = jnp.exp(logp)                          # sigmoid(x) from one extra exp
        term1 = _pow(1.0 - p, gamma) * logp
        term2 = _pow(p, gamma) * log1mp
        pos_m = (lab == cid).astype(jnp.float32)
        neg_m = jnp.logical_and(lab != cid, lab >= 0).astype(jnp.float32)
        fac_ref[...] += -pos_m * alpha * term1 - neg_m * (1.0 - alpha) * term2

        # ---- positive-location losses ----
        pos = lab > 0                              # (1, Tm)
        mf = pos.astype(jnp.float32)
        bt = jnp.where(pos, bt_ref[...], 1.0)      # masked rows -> safe dummies (no NaN/Inf)
        kt = jnp.where(pos, kt_ref[...], 1.0)
        bp = jnp.where(pos, bp_ref[...], 1.0)
        cp = cp_ref[...]                           # (1, Tm) centerness logits

        tl = bt[0:1, :]; tt = bt[1:2, :]; tr = bt[2:3, :]; tb = bt[3:4, :]
        kl = kt[0:1, :]; ktp = kt[1:2, :]; kr = kt[2:3, :]; kb = kt[3:4, :]
        pl_ = bp[0:1, :]; pt = bp[1:2, :]; pr = bp[2:3, :]; pb = bp[3:4, :]

        # compute_centerness_targets (ratios collapsed so each needs a single divide)
        ppp = (kl * tr) / (kr * tl)                # (kl/kr)/(tl/tr)
        qqq = (ktp * tb) / (kb * tt)               # (kt/kb)/(tt/tb)
        rrr = (kl * tt) / (ktp * tl)               # (kl/kt)/(tl/tt)

        def fold(v):                               # abs(1/v) if |v| > 1 else |v|
            av = jnp.abs(v)
            return jnp.minimum(av, jnp.abs(1.0 / v))

        centerness = jnp.sqrt(fold(ppp) * fold(qqq) * fold(rrr))

        # IOULoss
        target_area = (tl + tr) * (tt + tb)
        pred_area = (pl_ + pr) * (pt + pb)
        w_i = jnp.minimum(pl_, tl) + jnp.minimum(pr, tr)
        h_i = jnp.minimum(pb, tb) + jnp.minimum(pt, tt)
        a_i = w_i * h_i
        a_u = target_area + pred_area - a_i
        ious = (a_i + 1.0) / (a_u + 1.0)
        if loc_loss_type == "iou":
            loss = -jnp.log(ious)
        elif loc_loss_type == "giou":
            gw = jnp.maximum(pl_, tl) + jnp.maximum(pr, tr)
            gh = jnp.maximum(pb, tb) + jnp.maximum(pt, tt)
            gi = gw * gh + 1e-7
            gious = ious - (gi - a_u) / gi
            loss = 1.0 - gious
        else:
            raise ValueError(loc_loss_type)

        # BCEWithLogits(cp, centerness) = (1 - z) * cp - log_sigmoid(cp)
        bce = (1.0 - centerness) * cp - _log_sigmoid(cp)

        acc_ref[1:2, :] += mf * loss * centerness
        acc_ref[2:3, :] += mf * centerness
        acc_ref[3:4, :] += mf * bce
        acc_ref[4:5, :] += mf * loss
        acc_ref[5:6, :] += mf

        @pl.when(pl.program_id(0) == pl.num_programs(0) - 1)
        def _finalize():
            sums = jnp.sum(acc_ref[...], axis=1, keepdims=True)            # (8, 1)
            focal = jnp.sum(fac_ref[...], axis=(0, 1), keepdims=True)      # (1, 1)
            row = lax.broadcasted_iota(jnp.int32, (8, 128), 0)
            out_ref[...] = jnp.where(row == 0,
                                     jnp.broadcast_to(focal, (8, 128)),
                                     jnp.broadcast_to(sums, (8, 128)))

    return kernel


# ----------------------------------------------------------------------------
# FCOS loss module (JAX / Pallas)
# ----------------------------------------------------------------------------
class FCOSLossPallas:
    def __init__(self, sizes, gamma, alpha, iou_loss_type, center_sample, fpn_strides, pos_radius):
        self.sizes = sizes
        self.gamma = float(gamma)
        self.alpha = float(alpha)
        self.iou_loss_type = iou_loss_type
        self.center_sample = bool(center_sample)
        self.strides = fpn_strides
        self.radius = float(pos_radius)

    # ---- kernel 1 wrapper: one batched pallas_call for all images ----
    def _assign(self, pts, gt, gtT, batch, n_pad):
        tn = _pick_tile(n_pad)
        nblk = n_pad // tn
        g_pad = gt.shape[1]
        kern = _make_assign_kernel(self.center_sample)
        out_map = lambda bi, i: (0, bi * nblk + i)
        return pl.pallas_call(
            kern,
            out_shape=(jax.ShapeDtypeStruct((1, batch * n_pad), jnp.int32),
                       jax.ShapeDtypeStruct((4, batch * n_pad), jnp.float32),
                       jax.ShapeDtypeStruct((4, batch * n_pad), jnp.float32)),
            grid=(batch, nblk),
            in_specs=[pl.BlockSpec((8, tn), lambda bi, i: (0, i)),
                      pl.BlockSpec((1, g_pad, 8), lambda bi, i: (bi, 0, 0)),
                      pl.BlockSpec((1, 8, g_pad), lambda bi, i: (bi, 0, 0))],
            out_specs=(pl.BlockSpec((1, tn), out_map),
                       pl.BlockSpec((4, tn), out_map),
                       pl.BlockSpec((4, tn), out_map)),
            compiler_params=pltpu.CompilerParams(
                dimension_semantics=("parallel", "parallel")),
        )(pts, gt, gtT)

    # ---- kernel 2 wrapper: one fused accumulating pass over all points ----
    def _loss_sums(self, cls_all, box_p, box_t, key_t, center_p, labels):
        c, m = cls_all.shape
        tm = _pick_tile(m)
        kern = _make_loss_kernel(self.gamma, self.alpha, self.iou_loss_type)
        return pl.pallas_call(
            kern,
            out_shape=jax.ShapeDtypeStruct((8, 128), jnp.float32),
            grid=(m // tm,),
            in_specs=[pl.BlockSpec((c, tm), lambda i: (0, i)),
                      pl.BlockSpec((4, tm), lambda i: (0, i)),
                      pl.BlockSpec((4, tm), lambda i: (0, i)),
                      pl.BlockSpec((4, tm), lambda i: (0, i)),
                      pl.BlockSpec((1, tm), lambda i: (0, i)),
                      pl.BlockSpec((1, tm), lambda i: (0, i))],
            out_specs=pl.BlockSpec((8, 128), lambda i: (0, 0)),
            scratch_shapes=[pltpu.VMEM((c, tm), jnp.float32),
                            pltpu.VMEM((8, tm), jnp.float32)],
            compiler_params=pltpu.CompilerParams(
                dimension_semantics=("arbitrary",)),
        )(cls_all, box_p, box_t, key_t, center_p, labels)

    # ---- forward ----
    def __call__(self, locations, cls_pred, box_pred, center_pred, targets):
        batch = int(cls_pred[0].shape[0])
        n_class = int(cls_pred[0].shape[1])
        n_levels = len(locations)
        n_per_level = [int(p.shape[0]) for p in locations]
        n_total = sum(n_per_level)
        n_pad = ((n_total + LANE - 1) // LANE) * LANE

        # per-location table (shared across images), points on lanes
        point_all = jnp.concatenate(locations, 0).astype(jnp.float32)
        xs = point_all[:, 0]
        ys = point_all[:, 1]
        st = jnp.concatenate([jnp.full((n_per_level[l],), float(self.strides[l]) * self.radius,
                                       jnp.float32) for l in range(n_levels)], 0)
        lo = jnp.concatenate([jnp.full((n_per_level[l],), float(self.sizes[l][0]), jnp.float32)
                              for l in range(n_levels)], 0)
        hi = jnp.concatenate([jnp.full((n_per_level[l],), float(self.sizes[l][1]), jnp.float32)
                              for l in range(n_levels)], 0)
        ones = jnp.ones((n_total,), jnp.float32)
        zeros = jnp.zeros((n_total,), jnp.float32)
        pts = jnp.stack([xs, ys, st, lo, hi, ones, zeros, zeros], 0)       # (8, N)
        pts = jnp.pad(pts, ((0, 0), (0, n_pad - n_total)))

        # per-image GT tables, padded GTs get area = INF so they are never selected
        g_max = max(max(int(jnp.asarray(t["labels"]).shape[0]) for t in targets), 1)
        g_pad = ((g_max + 7) // 8) * 8
        tabs = []
        for tgt in targets:
            box = jnp.asarray(tgt["box"], jnp.float32).reshape(-1, 4)
            keyc = jnp.asarray(tgt["key"], jnp.float32).reshape(-1, 2)
            labl = jnp.asarray(tgt["labels"], jnp.float32).reshape(-1, 1)
            # TODO(synk): BoxList.area() semantics assumed to be (x2-x1)*(y2-y1) for xyxy mode.
            area = ((box[:, 2] - box[:, 0]) * (box[:, 3] - box[:, 1]))[:, None]
            tab = jnp.concatenate([box, keyc, labl, area], axis=1)         # (G, 8)
            g = int(tab.shape[0])
            pad = jnp.concatenate([jnp.zeros((g_pad - g, 7), jnp.float32),
                                   jnp.full((g_pad - g, 1), INF_F, jnp.float32)], axis=1)
            tabs.append(jnp.concatenate([tab, pad], axis=0))
        gt = jnp.stack(tabs, 0)                                            # (B, G_pad, 8)
        gtT = jnp.transpose(gt, (0, 2, 1))                                 # (B, 8, G_pad)

        labels, box_t, key_t = self._assign(pts, gt, gtT, batch, n_pad)

        # predictions: NCHW is already channel-major -> (C, H*W) per image with no transpose,
        # then level-concat per image and image-concat along lanes (image-major point order).
        def flatten(preds, c):
            per_img = jnp.concatenate([p.reshape(batch, c, -1) for p in preds], axis=2)
            per_img = jnp.pad(per_img, ((0, 0), (0, 0), (0, n_pad - n_total)))
            return jnp.transpose(per_img, (1, 0, 2)).reshape(c, batch * n_pad)

        cls_all = flatten(cls_pred, n_class).astype(jnp.float32)
        box_all = flatten(box_pred, 4).astype(jnp.float32)
        center_all = flatten(center_pred, 1).astype(jnp.float32)

        res = self._loss_sums(cls_all, box_all, box_t, key_t, center_all, labels)
        focal_sum = res[0, 0]
        s_lw = res[1, 0]       # sum(loss * centerness) over positives
        s_w = res[2, 0]        # sum(centerness) over positives
        s_bce = res[3, 0]      # sum(BCE) over positives
        s_l = res[4, 0]        # sum(loss) over positives
        num_pos = res[5, 0]

        cls_loss = focal_sum / (num_pos + batch)
        np_safe = jnp.where(num_pos > 0, num_pos, 1.0)
        sw_safe = jnp.where(s_w > 0, s_w, 1.0)
        box_loss = jnp.where(num_pos > 0,
                             jnp.where(s_w > 0, s_lw / sw_safe, s_l / np_safe),
                             0.0)
        center_loss = jnp.where(num_pos > 0, s_bce / np_safe, 0.0)
        return cls_loss, box_loss, center_loss


def make_locations(h, w, stride):
    ys = jnp.arange(h, dtype=jnp.float32) * stride + stride // 2
    xs = jnp.arange(w, dtype=jnp.float32) * stride + stride // 2
    yy, xx = jnp.meshgrid(ys, xs, indexing="ij")
    return jnp.stack([xx.reshape(-1), yy.reshape(-1)], axis=1)


if __name__ == "__main__":
    key = jax.random.PRNGKey(0)
    batch, n_class = 2, 4
    level_hw = [(8, 8), (4, 4)]
    strides = (8, 16)
    sizes = ((-1, 64), (64, INF))

    locations = [make_locations(h, w, s) for (h, w), s in zip(level_hw, strides)]

    rngs = jax.random.split(key, 16)
    cls_pred, box_pred, center_pred = [], [], []
    for li, (h, w) in enumerate(level_hw):
        cls_pred.append(jax.random.normal(rngs[3 * li + 0], (batch, n_class, h, w), jnp.float32))
        box_pred.append(jnp.abs(jax.random.normal(rngs[3 * li + 1], (batch, 4, h, w),
                                                  jnp.float32)) * strides[li] + 1.0)
        center_pred.append(jax.random.normal(rngs[3 * li + 2], (batch, 1, h, w), jnp.float32))

    # synthetic ground truth: one "BoxList" per image (xyxy boxes, key = box center, labels >= 1)
    targets = []
    for b in range(batch):
        kb = jax.random.split(rngs[8 + b], 3)
        x1y1 = jax.random.uniform(kb[0], (3, 2), minval=0.0, maxval=32.0)
        wh = jax.random.uniform(kb[1], (3, 2), minval=8.0, maxval=28.0)
        box = jnp.concatenate([x1y1, x1y1 + wh], axis=1)
        ctr = jnp.stack([(box[:, 0] + box[:, 2]) / 2, (box[:, 1] + box[:, 3]) / 2], axis=1)
        glabels = jax.random.randint(kb[2], (3,), 1, n_class + 1)
        targets.append({"box": box, "key": ctr, "labels": glabels})

    loss_fn = FCOSLossPallas(sizes=sizes, gamma=2.0, alpha=0.25, iou_loss_type="giou",
                             center_sample=True, fpn_strides=strides, pos_radius=1.5)

    cls_loss, box_loss, center_loss = loss_fn(locations, cls_pred, box_pred, center_pred, targets)
    jax.block_until_ready((cls_loss, box_loss, center_loss))
    print("KERNEL_OK")
</pallas_src>

<mosaic_0001>
module attributes {stable_mosaic.version = 11 : i64} {
  func.func @kernel(%arg0: i32, %arg1: i32, %arg2: memref<8x128xf32, #tpu.memory_space<vmem>>, %arg3: memref<1x8x8xf32, #tpu.memory_space<vmem>>, %arg4: memref<1x8x8xf32, #tpu.memory_space<vmem>>, %arg5: memref<1x128xi32, #tpu.memory_space<vmem>>, %arg6: memref<4x128xf32, #tpu.memory_space<vmem>>, %arg7: memref<4x128xf32, #tpu.memory_space<vmem>>) attributes {dimension_semantics = [#tpu.dimension_semantics<parallel>, #tpu.dimension_semantics<parallel>], iteration_bounds = array<i64: 2, 1>, scalar_prefetch = 0 : i64, scratch_operands = 0 : i64, tpu.core_type = #tpu.core_type<tc>, window_params = [{transform_indices = @transform_0, window_bounds = array<i64: 8, 128>}, {transform_indices = @transform_1, window_bounds = array<i64: 1, 8, 8>}, {transform_indices = @transform_2, window_bounds = array<i64: 1, 8, 8>}, {transform_indices = @transform_3, window_bounds = array<i64: 1, 128>}, {transform_indices = @transform_4, window_bounds = array<i64: 4, 128>}, {transform_indices = @transform_5, window_bounds = array<i64: 4, 128>}]} {
    %c0 = arith.constant 0 : index
    %c0_0 = arith.constant 0 : index
    %0 = vector.load %arg2[%c0, %c0_0] : memref<8x128xf32, #tpu.memory_space<vmem>>, vector<8x128xf32>
    %1 = vector.extract_strided_slice %0 {offsets = [0, 0], sizes = [1, 128], strides = [1, 1]} : vector<8x128xf32> to vector<1x128xf32>
    %2 = vector.extract_strided_slice %0 {offsets = [1, 0], sizes = [1, 128], strides = [1, 1]} : vector<8x128xf32> to vector<1x128xf32>
    %3 = vector.extract_strided_slice %0 {offsets = [2, 0], sizes = [1, 128], strides = [1, 1]} : vector<8x128xf32> to vector<1x128xf32>
    %4 = vector.extract_strided_slice %0 {offsets = [3, 0], sizes = [1, 128], strides = [1, 1]} : vector<8x128xf32> to vector<1x128xf32>
    %5 = vector.extract_strided_slice %0 {offsets = [4, 0], sizes = [1, 128], strides = [1, 1]} : vector<8x128xf32> to vector<1x128xf32>
    %6 = vector.extract_strided_slice %0 {offsets = [5, 0], sizes = [1, 128], strides = [1, 1]} : vector<8x128xf32> to vector<1x128xf32>
    %c0_1 = arith.constant 0 : index
    %c0_2 = arith.constant 0 : index
    %c0_3 = arith.constant 0 : index
    %7 = vector.load %arg3[%c0_1, %c0_2, %c0_3] : memref<1x8x8xf32, #tpu.memory_space<vmem>>, vector<1x8x8xf32>
    %8 = vector.shape_cast %7 : vector<1x8x8xf32> to vector<8x8xf32>
    %c0_4 = arith.constant 0 : index
    %c0_5 = arith.constant 0 : index
    %c0_6 = arith.constant 0 : index
    %9 = vector.load %arg4[%c0_4, %c0_5, %c0_6] : memref<1x8x8xf32, #tpu.memory_space<vmem>>, vector<1x8x8xf32>
    %10 = vector.shape_cast %9 : vector<1x8x8xf32> to vector<8x8xf32>
    %11 = vector.extract_strided_slice %8 {offsets = [0, 0], sizes = [8, 1], strides = [1, 1]} : vector<8x8xf32> to vector<8x1xf32>
    %12 = vector.extract_strided_slice %8 {offsets = [0, 1], sizes = [8, 1], strides = [1, 1]} : vector<8x8xf32> to vector<8x1xf32>
    %13 = vector.extract_strided_slice %8 {offsets = [0, 2], sizes = [8, 1], strides = [1, 1]} : vector<8x8xf32> to vector<8x1xf32>
    %14 = vector.extract_strided_slice %8 {offsets = [0, 3], sizes = [8, 1], strides = [1, 1]} : vector<8x8xf32> to vector<8x1xf32>
    %15 = vector.extract_strided_slice %8 {offsets = [0, 7], sizes = [8, 1], strides = [1, 1]} : vector<8x8xf32> to vector<8x1xf32>
    %16 = vector.broadcast %1 : vector<1x128xf32> to vector<8x128xf32>
    %17 = vector.broadcast %11 : vector<8x1xf32> to vector<8x128xf32>
    %18 = arith.subf %16, %17 : vector<8x128xf32>
    %19 = vector.broadcast %2 : vector<1x128xf32> to vector<8x128xf32>
    %20 = vector.broadcast %12 : vector<8x1xf32> to vector<8x128xf32>
    %21 = arith.subf %19, %20 : vector<8x128xf32>
    %22 = vector.broadcast %13 : vector<8x1xf32> to vector<8x128xf32>
    %23 = vector.broadcast %1 : vector<1x128xf32> to vector<8x128xf32>
    %24 = arith.subf %22, %23 : vector<8x128xf32>
    %25 = vector.broadcast %14 : vector<8x1xf32> to vector<8x128xf32>
    %26 = vector.broadcast %2 : vector<1x128xf32> to vector<8x128xf32>
    %27 = arith.subf %25, %26 : vector<8x128xf32>
    %28 = arith.addf %11, %13 : vector<8x1xf32>
    %cst = arith.constant 5.000000e-01 : f32
    %29 = vector.broadcast %cst : f32 to vector<8x1xf32>
    %30 = arith.mulf %28, %29 : vector<8x1xf32>
    %31 = arith.addf %12, %14 : vector<8x1xf32>
    %cst_7 = arith.constant 5.000000e-01 : f32
    %32 = vector.broadcast %cst_7 : f32 to vector<8x1xf32>
    %33 = arith.mulf %31, %32 : vector<8x1xf32>
    %34 = vector.broadcast %30 : vector<8x1xf32> to vector<8x128xf32>
    %35 = vector.broadcast %3 : vector<1x128xf32> to vector<8x128xf32>
    %36 = arith.subf %34, %35 : vector<8x128xf32>
    %37 = vector.broadcast %33 : vector<8x1xf32> to vector<8x128xf32>
    %38 = vector.broadcast %3 : vector<1x128xf32> to vector<8x128xf32>
    %39 = arith.subf %37, %38 : vector<8x128xf32>
    %40 = vector.broadcast %30 : vector<8x1xf32> to vector<8x128xf32>
    %41 = vector.broadcast %3 : vector<1x128xf32> to vector<8x128xf32>
    %42 = arith.addf %40, %41 : vector<8x128xf32>
    %43 = vector.broadcast %33 : vector<8x1xf32> to vector<8x128xf32>
    %44 = vector.broadcast %3 : vector<1x128xf32> to vector<8x128xf32>
    %45 = arith.addf %43, %44 : vector<8x128xf32>
    %46 = vector.broadcast %11 : vector<8x1xf32> to vector<8x128xf32>
    %47 = arith.maximumf %36, %46 : vector<8x128xf32>
    %48 = vector.broadcast %12 : vector<8x1xf32> to vector<8x128xf32>
    %49 = arith.maximumf %39, %48 : vector<8x128xf32>
    %50 = vector.broadcast %13 : vector<8x1xf32> to vector<8x128xf32>
    %51 = arith.minimumf %42, %50 : vector<8x128xf32>
    %52 = vector.broadcast %14 : vector<8x1xf32> to vector<8x128xf32>
    %53 = arith.minimumf %45, %52 : vector<8x128xf32>
    %54 = vector.broadcast %1 : vector<1x128xf32> to vector<8x128xf32>
    %55 = arith.subf %54, %47 : vector<8x128xf32>
    %56 = vector.broadcast %1 : vector<1x128xf32> to vector<8x128xf32>
    %57 = arith.subf %51, %56 : vector<8x128xf32>
    %58 = vector.broadcast %2 : vector<1x128xf32> to vector<8x128xf32>
    %59 = arith.subf %58, %49 : vector<8x128xf32>
    %60 = vector.broadcast %2 : vector<1x128xf32> to vector<8x128xf32>
    %61 = arith.subf %53, %60 : vector<8x128xf32>
    %62 = arith.minimumf %55, %57 : vector<8x128xf32>
    %63 = arith.minimumf %59, %61 : vector<8x128xf32>
    %64 = arith.minimumf %62, %63 : vector<8x128xf32>
    %cst_8 = arith.constant 0.000000e+00 : f32
    %65 = vector.broadcast %cst_8 : f32 to vector<8x128xf32>
    %66 = arith.cmpf ogt, %64, %65 : vector<8x128xf32>
    %67 = vector.extract_strided_slice %30 {offsets = [0, 0], sizes = [1, 1], strides = [1, 1]} : vector<8x1xf32> to vector<1x1xf32>
    %cst_9 = arith.constant 0.000000e+00 : f32
    %68 = vector.broadcast %cst_9 : f32 to vector<1x1xf32>
    %69 = arith.cmpf oeq, %67, %68 : vector<1x1xf32>
    %cst_10 = arith.constant dense<true> : vector<1x1xi1>
    %70 = arith.xori %69, %cst_10 : vector<1x1xi1>
    %71 = vector.broadcast %70 : vector<1x1xi1> to vector<8x128xi1>
    %72 = arith.andi %66, %71 : vector<8x128xi1>
    %73 = arith.maximumf %18, %24 : vector<8x128xf32>
    %74 = arith.maximumf %21, %27 : vector<8x128xf32>
    %75 = arith.maximumf %73, %74 : vector<8x128xf32>
    %76 = vector.broadcast %4 : vector<1x128xf32> to vector<8x128xf32>
    %77 = arith.cmpf oge, %75, %76 : vector<8x128xf32>
    %78 = vector.broadcast %5 : vector<1x128xf32> to vector<8x128xf32>
    %79 = arith.cmpf ole, %75, %78 : vector<8x128xf32>
    %80 = arith.andi %77, %79 : vector<8x128xi1>
    %81 = arith.andi %72, %80 : vector<8x128xi1>
    %cst_11 = arith.constant 1.000000e+08 : f32
    %82 = vector.shape_cast %15 : vector<8x1xf32> to vector<8x1xf32>
    %83 = vector.broadcast %82 : vector<8x1xf32> to vector<8x128xf32>
    %84 = vector.broadcast %cst_11 : f32 to vector<8x128xf32>
    %85 = arith.select %81, %83, %84 : vector<8x128xi1>, vector<8x128xf32>
    %cst_12 = arith.constant dense<0x7F800000> : vector<128xf32>
    %86 = vector.multi_reduction <minimumf>, %85, %cst_12 [0] : vector<8x128xf32> to vector<128xf32>
    %87 = vector.shape_cast %86 : vector<128xf32> to vector<1x128xf32>
    %88 = tpu.iota {dimensions = array<i32: 0>} : vector<8x128xi32>
    %89 = vector.broadcast %87 : vector<1x128xf32> to vector<8x128xf32>
    %90 = arith.cmpf oeq, %85, %89 : vector<8x128xf32>
    %c8_i32 = arith.constant 8 : i32
    %91 = vector.broadcast %c8_i32 : i32 to vector<8x128xi32>
    %92 = arith.select %90, %88, %91 : vector<8x128xi1>, vector<8x128xi32>
    %cst_13 = arith.constant dense<2147483647> : vector<128xi32>
    %93 = vector.multi_reduction <minsi>, %92, %cst_13 [0] : vector<8x128xi32> to vector<128xi32>
    %94 = vector.shape_cast %93 : vector<128xi32> to vector<1x128xi32>
    %95 = vector.broadcast %94 : vector<1x128xi32> to vector<8x128xi32>
    %96 = arith.cmpi eq, %88, %95 : vector<8x128xi32>
    %97 = arith.extui %96 : vector<8x128xi1> to vector<8x128xi32>
    %98 = arith.sitofp %97 : vector<8x128xi32> to vector<8x128xf32>
    %cst_14 = arith.constant dense<0.000000e+00> : vector<8x128xf32>
    %99 = tpu.matmul %10, %98, %cst_14 {dimension_numbers = #tpu.dot_dimension_numbers<[1], [0], [0], [1], [0, 0, 1, 1], [], []>, precision = #tpu.contract_precision<fp32>} : vector<8x8xf32>, vector<8x128xf32>, vector<8x128xf32> -> vector<8x128xf32>
    %100 = vector.extract_strided_slice %99 {offsets = [0, 0], sizes = [1, 128], strides = [1, 1]} : vector<8x128xf32> to vector<1x128xf32>
    %101 = vector.extract_strided_slice %99 {offsets = [1, 0], sizes = [1, 128], strides = [1, 1]} : vector<8x128xf32> to vector<1x128xf32>
    %102 = vector.extract_strided_slice %99 {offsets = [2, 0], sizes = [1, 128], strides = [1, 1]} : vector<8x128xf32> to vector<1x128xf32>
    %103 = vector.extract_strided_slice %99 {offsets = [3, 0], sizes = [1, 128], strides = [1, 1]} : vector<8x128xf32> to vector<1x128xf32>
    %104 = vector.extract_strided_slice %99 {offsets = [4, 0], sizes = [1, 128], strides = [1, 1]} : vector<8x128xf32> to vector<1x128xf32>
    %105 = vector.extract_strided_slice %99 {offsets = [5, 0], sizes = [1, 128], strides = [1, 1]} : vector<8x128xf32> to vector<1x128xf32>
    %106 = vector.extract_strided_slice %99 {offsets = [6, 0], sizes = [1, 128], strides = [1, 1]} : vector<8x128xf32> to vector<1x128xf32>
    %107 = arith.subf %1, %100 : vector<1x128xf32>
    %c0_15 = arith.constant 0 : index
    %c0_16 = arith.constant 0 : index
    %108 = vector.load %arg6[%c0_15, %c0_16] : memref<4x128xf32, #tpu.memory_space<vmem>>, vector<1x128xf32>
    tpu.vector_store %arg6[%c0_15, %c0_16], %107 {strides = array<i32>} : memref<4x128xf32, #tpu.memory_space<vmem>>, vector<1x128xf32>,
    %109 = arith.subf %2, %101 : vector<1x128xf32>
    %c1 = arith.constant 1 : index
    %c0_17 = arith.constant 0 : index
    %110 = vector.load %arg6[%c1, %c0_17] : memref<4x128xf32, #tpu.memory_space<vmem>>, vector<1x128xf32>
    tpu.vector_store %arg6[%c1, %c0_17], %109 {strides = array<i32>} : memref<4x128xf32, #tpu.memory_space<vmem>>, vector<1x128xf32>,
    %111 = arith.subf %102, %1 : vector<1x128xf32>
    %c2 = arith.constant 2 : index
    %c0_18 = arith.constant 0 : index
    %112 = vector.load %arg6[%c2, %c0_18] : memref<4x128xf32, #tpu.memory_space<vmem>>, vector<1x128xf32>
    tpu.vector_store %arg6[%c2, %c0_18], %111 {strides = array<i32>} : memref<4x128xf32, #tpu.memory_space<vmem>>, vector<1x128xf32>,
    %113 = arith.subf %103, %2 : vector<1x128xf32>
    %c3 = arith.constant 3 : index
    %c0_19 = arith.constant 0 : index
    %114 = vector.load %arg6[%c3, %c0_19] : memref<4x128xf32, #tpu.memory_space<vmem>>, vector<1x128xf32>
    tpu.vector_store %arg6[%c3, %c0_19], %113 {strides = array<i32>} : memref<4x128xf32, #tpu.memory_space<vmem>>, vector<1x128xf32>,
    %115 = arith.subf %104, %100 : vector<1x128xf32>
    %c0_20 = arith.constant 0 : index
    %c0_21 = arith.constant 0 : index
    %116 = vector.load %arg7[%c0_20, %c0_21] : memref<4x128xf32, #tpu.memory_space<vmem>>, vector<1x128xf32>
    tpu.vector_store %arg7[%c0_20, %c0_21], %115 {strides = array<i32>} : memref<4x128xf32, #tpu.memory_space<vmem>>, vector<1x128xf32>,
    %117 = arith.subf %105, %101 : vector<1x128xf32>
    %c1_22 = arith.constant 1 : index
    %c0_23 = arith.constant 0 : index
    %118 = vector.load %arg7[%c1_22, %c0_23] : memref<4x128xf32, #tpu.memory_space<vmem>>, vector<1x128xf32>
    tpu.vector_store %arg7[%c1_22, %c0_23], %117 {strides = array<i32>} : memref<4x128xf32, #tpu.memory_space<vmem>>, vector<1x128xf32>,
    %119 = arith.subf %102, %104 : vector<1x128xf32>
    %c2_24 = arith.constant 2 : index
    %c0_25 = arith.constant 0 : index
    %120 = vector.load %arg7[%c2_24, %c0_25] : memref<4x128xf32, #tpu.memory_space<vmem>>, vector<1x128xf32>
    tpu.vector_store %arg7[%c2_24, %c0_25], %119 {strides = array<i32>} : memref<4x128xf32, #tpu.memory_space<vmem>>, vector<1x128xf32>,
    %121 = arith.subf %103, %105 : vector<1x128xf32>
    %c3_26 = arith.constant 3 : index
    %c0_27 = arith.constant 0 : index
    %122 = vector.load %arg7[%c3_26, %c0_27] : memref<4x128xf32, #tpu.memory_space<vmem>>, vector<1x128xf32>
    tpu.vector_store %arg7[%c3_26, %c0_27], %121 {strides = array<i32>} : memref<4x128xf32, #tpu.memory_space<vmem>>, vector<1x128xf32>,
    %cst_28 = arith.constant 5.000000e-01 : f32
    %123 = vector.broadcast %cst_28 : f32 to vector<1x128xf32>
    %124 = arith.addf %106, %123 : vector<1x128xf32>
    %125 = arith.fptosi %124 : vector<1x128xf32> to vector<1x128xi32>
    %cst_29 = arith.constant 1.000000e+08 : f32
    %126 = vector.broadcast %cst_29 : f32 to vector<1x128xf32>
    %127 = arith.cmpf oeq, %87, %126 : vector<1x128xf32>
    %c0_i32 = arith.constant 0 : i32
    %128 = vector.broadcast %c0_i32 : i32 to vector<1x128xi32>
    %129 = arith.select %127, %128, %125 : vector<1x128xi1>, vector<1x128xi32>
    %cst_30 = arith.constant 0.000000e+00 : f32
    %130 = vector.broadcast %cst_30 : f32 to vector<1x128xf32>
    %131 = arith.cmpf ogt, %6, %130 : vector<1x128xf32>
    %c-1_i32 = arith.constant -1 : i32
    %132 = vector.broadcast %c-1_i32 : i32 to vector<1x128xi32>
    %133 = arith.select %131, %129, %132 : vector<1x128xi1>, vector<1x128xi32>
    %c0_31 = arith.constant 0 : index
    %c0_32 = arith.constant 0 : index
    %134 = vector.load %arg5[%c0_31, %c0_32] : memref<1x128xi32, #tpu.memory_space<vmem>>, vector<1x128xi32>
    tpu.vector_store %arg5[%c0_31, %c0_32], %133 {strides = array<i32>} : memref<1x128xi32, #tpu.memory_space<vmem>>, vector<1x128xi32>,
    return
  }
  func.func @transform_0(%arg0: i32, %arg1: i32) -> (i32, i32) {
    %c0_i32 = arith.constant 0 : i32
    %c0_i32_0 = arith.constant 0 : i32
    return %c0_i32, %arg1 : i32, i32
  }
  func.func @transform_1(%arg0: i32, %arg1: i32) -> (i32, i32, i32) {
    %c0_i32 = arith.constant 0 : i32
    %c0_i32_0 = arith.constant 0 : i32
    %c0_i32_1 = arith.constant 0 : i32
    return %arg0, %c0_i32, %c0_i32_0 : i32, i32, i32
  }
  func.func @transform_2(%arg0: i32, %arg1: i32) -> (i32, i32, i32) {
    %c0_i32 = arith.constant 0 : i32
    %c0_i32_0 = arith.constant 0 : i32
    %c0_i32_1 = arith.constant 0 : i32
    return %arg0, %c0_i32, %c0_i32_0 : i32, i32, i32
  }
  func.func @transform_3(%arg0: i32, %arg1: i32) -> (i32, i32) {
    %c1_i32 = arith.constant 1 : i32
    %0 = arith.muli %arg0, %c1_i32 : i32
    %1 = arith.addi %0, %arg1 : i32
    %c0_i32 = arith.constant 0 : i32
    %c0_i32_0 = arith.constant 0 : i32
    return %c0_i32, %1 : i32, i32
  }
  func.func @transform_4(%arg0: i32, %arg1: i32) -> (i32, i32) {
    %c1_i32 = arith.constant 1 : i32
    %0 = arith.muli %arg0, %c1_i32 : i32
    %1 = arith.addi %0, %arg1 : i32
    %c0_i32 = arith.constant 0 : i32
    %c0_i32_0 = arith.constant 0 : i32
    return %c0_i32, %1 : i32, i32
  }
  func.func @transform_5(%arg0: i32, %arg1: i32) -> (i32, i32) {
    %c1_i32 = arith.constant 1 : i32
    %0 = arith.muli %arg0, %c1_i32 : i32
    %1 = arith.addi %0, %arg1 : i32
    %c0_i32 = arith.constant 0 : i32
    %c0_i32_0 = arith.constant 0 : i32
    return %c0_i32, %1 : i32, i32
  }
}

</mosaic_0001>

<bundles_post_ra>
// kernel: tpu_custom_call.1
= control target key start
LH: loop header
LB: loop body
LE: loop exit
PB: predicated region body
PF: predicated region fallthrough
CT: control target
= control target key end

     0   :  { %s1910_s0 = inlined_call_operand.hbm [shape: f32[8,128], index: 0, kind: input, shape index: {}]   ;;  %s1911_s1 = inlined_call_operand.hbm [shape: f32[2,8,8], index: 1, kind: input, shape index: {}]   ;;  %s1912_s2 = inlined_call_operand.hbm [shape: f32[2,8,8], index: 2, kind: input, shape index: {}]   ;;  %s1913_s3 = inlined_call_operand.hbm [shape: s32[1,256], index: 3, kind: output, shape index: {0}]   ;;  %s1914_s4 = inlined_call_operand.hbm [shape: f32[4,256], index: 4, kind: output, shape index: {1}]   ;;  %s1915_s5 = inlined_call_operand.hbm [shape: f32[4,256], index: 5, kind: output, shape index: {2}]  }
   0x1   :  { %1920 = sst [smem:[#allocation16_spill]] %s1910_s0 }
   0x2   :  { %11 = vsyncpa [#allocation3], 0 }
   0x3   :  { %12 = vsyncpa [#allocation6], 0 }
   0x4   :  { %14 = vsyncpa [#allocation6 + $0x1], 0 }
   0x5   :  { %15 = vsyncpa [#allocation4], 0 }
   0x6   :  { %17 = vsyncpa [#allocation4 + $0x1], 0 }
   0x7   :  { %18 = vsyncpa [#allocation10], 0 }
   0x8   :  { %20 = vsyncpa [#allocation10 + $0x1], 0  ;;  %s1596_s18 = smov 0   ;;  %s1598_s19 = smov 0  }
   0x9   :  { %s1600_s20 = smov 0   ;;  %s1602_s21 = smov 0  }
   0xa   :  { %s1604_s22 = smov 0   ;;  %s1606_s23 = smov 0  }
   0xb LB: > { %s38_s24 = sadd.s32 1, %s1544_s22  ;;  %s71_s25 = sadd.s32 1, %s1536_s20  ;;  %s1548_s23 = sphi %s1606_s23, %s26_s23   ;;  %s1544_s22 = sphi %s1604_s22, %s1940_s22   ;;  %s1540_s21 = sphi %s1602_s21, %s1939_s21   ;;  %s1536_s20 = sphi %s1600_s20, %s1938_s20   ;;  %s1532_s19 = sphi %s1598_s19, %s1937_s19   ;;  %s1528_s18 = sphi %s1596_s18, %s1936_s18  }
   0xc   : > { %p40_p0 = scmp.ge.s32.totalorder %s38_s24, 2  ;;  %p78_p1 = scmp.ne.s32.totalorder %s1536_s20, %s1532_s19 }
   0xd   : > { %p79_p2 = scmp.eq.s32.totalorder %s1548_s23, 0  ;;  %p1257_p5 = scmp.lt.s32.totalorder %s1548_s23, 2 }
   0xe   : > { %s1942_s24 = smov (%p40_p0, %s38_s24), 0  ;;  %s231_s27 = sand.u32 1, %s1548_s23  }
   0xf   : > { %p80_p4 = por %p79_p2, %p78_p1  ;;  %s68_s26 = ssub.s32 %s1544_s22, %s1942_s24 }
  0x10   : > { %p69_p6 = scmp.eq.s32.totalorder %s68_s26, 0  ;;  %s233_s28 = sand.u32 1, %s1536_s20  }
  0x11   : > { %s1155_s29 = sshll.u32 %s1544_s22, 7  ;;  %s1646_s6 = sshll.u32 %s233_s28, 3 }
  0x12   : > { %s1644_s30 = scalar_select %p69_p6, %s1536_s20, %s71_s25  }
  0x13   : > { %s240_s9 = scalar_lea.hbm %s1911_s1, %s1155_s29  ;;  %p1653_p7 = pnand %p1257_p5, %p80_p4 }
  0x14   : > { %s235_s11 = scalar_lea.vmem [#allocation5], %s1646_s6  ;;  %s1658_s13 = scalar_lea.sflag [#allocation6], %s231_s27 }
  0x15   : > { %s242_s12 = sshll.u32 %s235_s11, 4  ;;  %p1328_p8 = pneg %p1653_p7  ;;  %s243_s12 = int_to_ptr.vmem [resolvable:$true] %s242_s12 }
  0x16   : > { %s1339_s14 = scalar_lea.vmem %s243_s12, 128  ;;  %s1550_s15 = smov [#allocation5]  }
  0x17   : > { %p1340_p9 = scmp.ne.s32.totalorder %s243_s12, %s1339_s14  ;;  %s1344_s16 = sshll.u32 %s1550_s15, 4  ;;  %s1345_s16 = int_to_ptr.vmem [resolvable:$false] %s1344_s16 }
  0x18   : > { %s1346_s17 = scalar_lea.vmem %s1345_s16, 256  ;;  %p1347_p12 = scmp.lt.s32.totalorder %s243_s12, %s1345_s16 }
  0x19   : > { %p1342_p10 = pnand %p1340_p9, %p1328_p8  ;;  %p1348_p13 = scmp.lt.s32.totalorder %s1346_s17, %s1339_s14 }
  0x1b   : > { %p1343_p11 = pneg %p1342_p10  ;;  %p1349_p0 = por %p1348_p13, %p1347_p12 }
  0x1d   : > { %p1350_p2 = pnand %p1349_p0, %p1343_p11 }
  0x1f   : > { %1353 = shalt.err (!%p1350_p2)
}
  0x20   : > { %1242 = dma.hbm_to_vmem [thread:$0]  (!%p1653_p7), %s240_s9, 128, %s243_s12, %s1658_s13  }
  0x21   : > { %s1669_s25 = sadd.s32 4294967295, %s1548_s23   ;;  %s1916_s26 = sadd.s32 4294967294, %s1548_s23  }
  0x22   : > { %p84_p4 = scmp.ne.s32.totalorder %s1532_s19, %s1528_s18  ;;  %p1917_p5 = scmp.eq.s32.totalorder %s1669_s25, 0 }
  0x23   : > { %p136_p6 = scmp.eq.s32.totalorder %s1669_s25, 1  ;;  %p142_p9 = scmp.eq.s32.totalorder %s1916_s26, 1 }
  0x24   : > { %p1151_p10 = scmp.ge.s32.totalorder %s1548_s23, 1  ;;  %p1681_p11 = por %p1917_p5, %p84_p4 }
  0x25   : > { %p1688_p12 = por %p136_p6, %p78_p1  ;;  %p1692_p13 = por %p142_p9, %p84_p4 }
  0x26   : > { %s1922_s27 = scalar_select %p1681_p11, 1, 0 }
  0x27   : > { %s1923_s28 = scalar_select %p1688_p12, 1, 0 }
  0x28   : > { %s1924_s7 = scalar_select %p1692_p13, 1, 0 }
  0x29   : > { %p205_p0 = scmp.lt.s32.totalorder %s1548_s23, 3  ;;  %s258_s11 = scalar_lea.hbm %s1912_s2, %s1155_s29 }
  0x2a   : > { %s1551_s14 = smov [#allocation2]   ;;  %s253_s16 = scalar_lea.vmem [#allocation7], %s1646_s6 }
  0x2b   : > { %p1702_p2 = pnand %p1151_p10, %p205_p0  ;;  %s220_s15 = sshll.u32 %s1551_s14, 4  ;;  %s221_s15 = int_to_ptr.vmem [resolvable:$true] %s220_s15 }
  0x2c   : > { %s260_s17 = sshll.u32 %s253_s16, 4  ;;  %s1552_s8 = smov [#allocation7]   ;;  %s261_s17 = int_to_ptr.vmem [resolvable:$true] %s260_s17 }
  0x2d   : > { %s1367_s26 = scalar_lea.vmem %s261_s17, 128  ;;  %s1372_s29 = sshll.u32 %s1552_s8, 4  ;;  %s1373_s29 = int_to_ptr.vmem [resolvable:$false] %s1372_s29 }
  0x2e   : > { %p1368_p4 = scmp.ne.s32.totalorder %s261_s17, %s1367_s26  ;;  %s1374_s9 = scalar_lea.vmem %s1373_s29, 256 }
  0x2f   : > { %p1375_p10 = scmp.lt.s32.totalorder %s261_s17, %s1373_s29  ;;  %p1376_p0 = scmp.lt.s32.totalorder %s1374_s9, %s1367_s26 }
  0x30   : > { %p1370_p6 = pnand %p1368_p4, %p1328_p8 }
  0x31   : > { %p1377_p3 = por %p1376_p0, %p1375_p10 }
  0x32   : > { %p1371_p9 = pneg %p1370_p6 }
  0x34   : > { %p1378_p5 = pnand %p1377_p3, %p1371_p9 }
  0x36   : > { %1381 = shalt.err (!%p1378_p5)
}
  0x37   : > { %1245 = dma.hbm_to_vmem [thread:$0]  (!%p1653_p7), %s258_s11, 128, %s261_s17, %s1658_s13  }
  0x38   : > { %p1926_p1 = scmp.eq.s32.totalorder %s1669_s25, 0  ;;  %p1927_p8 = pneg %p1702_p2 }
  0x39   : > { %s1393_s6 = scalar_lea.vmem %s221_s15, 128  ;;  %p1401_p0 = scmp.lt.s32.totalorder %s221_s15, %s221_s15 }
  0x3a   : > { %p1236_p4 = pnand %p1927_p8, %p1926_p1  ;;  %p1394_p13 = scmp.ne.s32.totalorder %s221_s15, %s1393_s6 }
  0x3b   : > { %p1402_p10 = scmp.lt.s32.totalorder %s1393_s6, %s1393_s6 }
  0x3c   : > { %p1384_p6 = pneg %p1236_p4 }
  0x3d   : > { %p1403_p3 = por %p1402_p10, %p1401_p0 }
  0x3e   : > { %p1396_p12 = pnand %p1394_p13, %p1384_p6 }
  0x40   : > { %p1397_p11 = pneg %p1396_p12 }
  0x42   : > { %p1404_p5 = pnand %p1403_p3, %p1397_p11 }
  0x44   : > { %1407 = shalt.err (!%p1404_p5)
}
  0x45   : > { %s1928_s0 = sld [smem:[#allocation16_spill]]  ;;  %p1929_p7 = scmp.eq.s32.totalorder (!%p1702_p2), %s1669_s25, 0 }
  0x47   : > { %269 = sbr.rel (%p1702_p2) target bundleno = 644 (0x284), region = 32 }
  0x4b   : > { %1238 = dma.hbm_to_vmem [thread:$0]  (!%p1236_p4), %s1928_s0, 128, %s221_s15, [#allocation3]  }
  0x4c   : > { %1511 = dma.done.wait (%p1929_p7), [#allocation3], 128   ;;  %p1930_p1 = pmov %p1929_p7 }
  0x4d   : > { %s275_s13 = sand.u32 1, %s1669_s25   ;;  %s1731_s11 = sand.u32 1, %s1532_s19  }
  0x4e   : > { %1513 = vsyncadd (%p1930_p1), [#allocation3], 4294967168  ;;  %s1160_s14 = sshll.u32 %s1731_s11, 3  ;;  %s276_s15 = scalar_lea.sflag [#allocation6], %s275_s13 }
  0x4f   : > { %s279_s12 = scalar_lea.vmem [#allocation5], %s1160_s14  ;;  %p1931_p11 = scmp.ne.s32.totalorder %s1922_s27, 0 }
  0x51   : > { %1515 = dma.done.wait (%p1931_p11), %s276_s15, 256  }
  0x52   : > { %1517 = vsyncadd (%p1931_p11), %s276_s15, 4294967040  ;;  %v1553_v0 = vmov 0   ;;  %v333_v1 = vld [vmem:[%s279_s12] sm:$0xff]  ;;  %s1554_s16 = smov 126   ;;  %v1555_v2 = vmov 1   ;;  %vm1556_vm1 = vmmov 1   ;;  %v335_v11 = vlaneseq }
  0x53   : > { %1319 = vset.pattern.permute.xlu1 %v1553_v0  ;;  %1321 = vset.pattern.permute.xlu0 %v1553_v0  ;;  %v1557_v7 = vmov 3   ;;  %v1558_v8 = vmov 2   ;;  %v1559_v9 = vmov 7   ;;  %v1560_v10 = vmov 0.0   ;;  %v1751_v16 = vld [vmem:[#allocation2] sm:$0xff]  ;;  %s288_s17 = scalar_lea.vmem [#allocation7], %s1160_s14 }
  0x54   : > { %364 = vrot.lane.b32.xlu0 %v333_v1, %s1554_s16  ;;  %341 = vperm.xlu1 %1319, %v333_v1   ;;  %vm1561_vm3 = vmmov 0   ;;  %v1748_v13 = vshrl.u32 %v335_v11, 7  ;;  %v334_v57 = vld [vmem:[%s288_s17] sm:$0xff]  ;;  %vm447_vm11 = vcmask 64512   ;;  %s1162_s8 = sshll.u32 %s1731_s11, 2  ;;  %s1171_s29 = sshll.u32 %s1540_s21, 6 }
  0x55   : > { %1187 = vmatprep.subr.mxu0 %v1560_v10  ;;  %1192 = vmatprep.subr.mxu1 %v1560_v10  ;;  %v449_v59 = vsel %vm447_vm11, %v334_v57, 0  ;;  %s321_s9 = scalar_lea.vmem [#allocation9], %s1162_s8  ;;  %s1793_s10 = scalar_lea.vmem [#allocation11], %s1162_s8 }
  0x56   : > { %1189 = vmatprep.mubr.msk.f32.mxu0 %vm1561_vm3, %v1560_v10  ;;  %1194 = vmatprep.mubr.msk.f32.mxu1 %vm1561_vm3, %v1560_v10  ;;  %v376_v14 = vsub.s32 2, %v1748_v13  ;;  %v337_v17 = vsub.s32 0, %v1748_v13  ;;  %v347_v18 = vsub.s32 1, %v1748_v13  ;;  %v410_v28 = vsub.s32 3, %v1748_v13  ;;  %s963_s6 = sshll.u32 %s321_s9, 4  ;;  %s977_s26 = sshll.u32 %s1793_s10, 4  ;;  %s1802_s6 = int_to_ptr.vmem [resolvable:$true] %s963_s6  ;;  %s1809_s26 = int_to_ptr.vmem [resolvable:$true] %s977_s26 }
  0x57   : > { %v415_v29 = vsub.s32 4, %v1748_v13  ;;  %v517_v62 = vand.u32 4294901760, %v449_v59  ;;  %s1800_s12 = scalar_lea.hbm %s1914_s4, %s1171_s29  ;;  %s1807_s17 = scalar_lea.hbm %s1915_s5, %s1171_s29 }
  0x58   : > { %1320 = vset.pattern.permute.xlu1 %v1555_v2  ;;  %v377_v19 = vrot.slane %v1751_v16, %v376_v14  ;;  %v338_v22 = vrot.slane %v1751_v16, %v337_v17  ;;  %v348_v23 = vrot.slane %v1751_v16, %v347_v18  ;;  %v411_v42 = vrot.slane %v1751_v16, %v410_v28  ;;  %s1813_s8 = scalar_lea.sflag [#allocation10], %s275_s13  ;;  %s1408_s14 = scalar_lea.vmem %s1802_s6, 64 }
  0x59   : > { %350 = vperm.xlu1 %1320, %v333_v1   ;;  %v416_v43 = vrot.slane %v1751_v16, %v415_v29  ;;  %v1562_v14 = vmov 1.0   ;;  %p1409_p12 = scmp.ne.s32.totalorder %s1802_s6, %s1408_s14  ;;  %p1932_p13 = scmp.ne.s32.totalorder %s1923_s28, 0 }
  0x5a   : > { %s1563_s15 = smov [#allocation9]  }
  0x5b   : > { %p1410_p2 = pnand %p1409_p12, %p1932_p13  ;;  %s1412_s16 = sshll.u32 %s1563_s15, 4  ;;  %s1413_s16 = int_to_ptr.vmem [resolvable:$false] %s1412_s16 }
  0x5c   : > { %s1414_s29 = scalar_lea.vmem %s1413_s16, 128  ;;  %p1415_p8 = scmp.lt.s32.totalorder %s1802_s6, %s1413_s16 }
  0x5d   : > { %p1411_p9 = pneg %p1410_p2  ;;  %p1416_p4 = scmp.lt.s32.totalorder %s1414_s29, %s1408_s14 }
  0x5f   : > { %p1417_p6 = por %p1416_p4, %p1415_p8 }
  0x61   : > { %p1418_p0 = pnand %p1417_p6, %p1411_p9 }
  0xc6   : > { %v365_v3 = vpop.permute.xlu0 %364 }
  0xc7   : > { %v367_v4 = vadd.f32 %v365_v3, %v333_v1 }
  0xc9   : > { %v368_v5 = vmul.f32 0.5, %v367_v4 }
  0xcb   : > { %380 = vperm.xlu1 %1320, %v368_v5   ;;  %371 = vperm.xlu0 %1321, %v368_v5   ;;  %vm398_vm0 = vcmp.eq.f32.partialorder %v368_v5, 0.0 }
  0xcc   : > { %vm399_vm2 = vmxor %vm398_vm0, %vm1556_vm1 }
  0xcd   : > { %v400_v6 = vsel %vm399_vm2, 1, %v1553_v0  ;;  %v518_v0 = vsub.f32 %v449_v59, %v517_v62 }
  0xce   : > { %1217 = vpush %v400_v6 }
  0xcf   : > { %1323 = vset.pattern.permute.xlu1 %v1557_v7  ;;  %1322 = vset.pattern.permute.xlu0 %v1558_v8  ;;  %v342_v12 = vpop.permute.xlu1 %341  ;;  %v519_v3 = vand.u32 4294901760, %v518_v0 }
  0xd0   : > { %360 = vperm.xlu1 %1323, %v333_v1   ;;  %355 = vperm.xlu0 %1322, %v333_v1   ;;  %v344_v32 = vsub.f32 %v338_v22, %v342_v12 }
  0xd1   : > { %v520_v6 = vsub.f32 %v518_v0, %v519_v3 }
  0xd4   : > { %1324 = vset.pattern.permute.xlu1 %v1559_v9  ;;  %1325 = vset.pattern.permute.xlu0 %v1559_v9  ;;  %v351_v15 = vpop.permute.xlu1 %350  ;;  %v521_v9 = vand.u32 4294901760, %v520_v6 }
  0xd5   : > { %421 = vperm.xlu1 %1324, %v333_v1   ;;  %v353_v33 = vsub.f32 %v348_v23, %v351_v15 }
  0xff   : > { %s1218_s27 = spop %1217 }
 0x100   : > { %v402_v51 = vstv %s1218_s27 }
 0x101   : > { %vm403_vm6 = vcmp.eq.s32.totalorder %v402_v51, 1 }
 0x146   : > { %v381_v20 = vpop.permute.xlu1 %380  ;;  %v372_v21 = vpop.permute.xlu0 %371 }
 0x147   : > { %v383_v24 = vsub.f32 %v381_v20, %v377_v19  ;;  %v378_v25 = vsub.f32 %v372_v21, %v377_v19  ;;  %v385_v30 = vadd.f32 %v381_v20, %v377_v19  ;;  %v384_v31 = vadd.f32 %v377_v19, %v372_v21 }
 0x149   : > { %v387_v26 = vmax.f32 %v383_v24, %v351_v15  ;;  %v386_v27 = vmax.f32 %v378_v25, %v342_v12 }
 0x14b   : > { %v361_v34 = vpop.permute.xlu1 %360  ;;  %v356_v35 = vpop.permute.xlu0 %355  ;;  %v392_v40 = vsub.f32 %v348_v23, %v387_v26  ;;  %v390_v41 = vsub.f32 %v338_v22, %v386_v27 }
 0x14c   : > { %v363_v36 = vsub.f32 %v361_v34, %v348_v23  ;;  %v389_v37 = vmin.f32 %v385_v30, %v361_v34  ;;  %v358_v38 = vsub.f32 %v356_v35, %v338_v22  ;;  %v388_v39 = vmin.f32 %v384_v31, %v356_v35 }
 0x14e   : > { %v393_v44 = vsub.f32 %v389_v37, %v348_v23  ;;  %v406_v45 = vmax.f32 %v353_v33, %v363_v36  ;;  %v391_v46 = vsub.f32 %v388_v39, %v338_v22  ;;  %v405_v47 = vmax.f32 %v344_v32, %v358_v38 }
 0x14f   : > { %v901_v33 = vrot.slane %v1751_v16, 6 }
 0x150   : > { %v395_v48 = vmin.f32 %v392_v40, %v393_v44  ;;  %v394_v49 = vmin.f32 %v390_v41, %v391_v46  ;;  %v407_v50 = vmax.f32 %v405_v47, %v406_v45  ;;  %v422_v53 = vpop.permute.xlu1 %421 }
 0x152   : > { %v396_v52 = vmin.f32 %v394_v49, %v395_v48  ;;  %vm412_vm4 = vcmp.ge.f32.partialorder %v407_v50, %v411_v42  ;;  %vm417_vm5 = vcmp.le.f32.partialorder %v407_v50, %v416_v43 }
 0x153   : > { %vm418_vm8 = vmand %vm412_vm4, %vm417_vm5 }
 0x154   : > { %vm397_vm7 = vcmp.gt.f32.partialorder %v396_v52, 0.0 }
 0x155   : > { %vm404_vm9 = vmand %vm397_vm7, %vm403_vm6 }
 0x156   : > { %vm419_vm10 = vmand %vm404_vm9, %vm418_vm8 }
 0x157   : > { %v424_v54 = vsel %vm419_vm10, %v422_v53, 1e+08 }
 0x158   : > { %v425_v55 = vrot.slane %v424_v54, 4 }
 0x15a   : > { %v426_v56 = vmin.f32 %v424_v54, %v425_v55 }
 0x15c   : > { %v427_v58 = vrot.slane %v426_v56, 2 }
 0x15e   : > { %v428_v60 = vmin.f32 %v426_v56, %v427_v58 }
 0x160   : > { %v429_v61 = vrot.slane %v428_v60, 1 }
 0x162   : > { %v1764_v63 = vmin.f32 %v428_v60, %v429_v61 }
 0x164   : > { %vm433_vm12 = vcmp.eq.f32.partialorder %v424_v54, %v1764_v63 }
 0x165   : > { %v434_v1 = vsel %vm433_vm12, %v1748_v13, 8 }
 0x166   : > { %v435_v2 = vrot.slane %v434_v1, 4 }
 0x168   : > { %vm436_vm13 = vcmp.lt.s32.totalorder %v434_v1, %v435_v2 }
 0x169   : > { %v437_v4 = vsel %vm436_vm13, %v434_v1, %v435_v2 }
 0x16a   : > { %v438_v5 = vrot.slane %v437_v4, 2 }
 0x16c   : > { %vm439_vm14 = vcmp.lt.s32.totalorder %v437_v4, %v438_v5 }
 0x16d   : > { %v440_v7 = vsel %vm439_vm14, %v437_v4, %v438_v5 }
 0x16e   : > { %v441_v8 = vrot.slane %v440_v7, 1 }
 0x170   : > { %vm442_vm15 = vcmp.lt.s32.totalorder %v440_v7, %v441_v8 }
 0x171   : > { %v443_v11 = vsel %vm442_vm15, %v440_v7, %v441_v8 }
 0x172   : > { %vm444_vm0 = vcmp.eq.s32.totalorder %v1748_v13, %v443_v11 }
 0x173   : > { %v1164_v12 = vsel %vm444_vm0, 1.0, %v1560_v10  ;;  %1188 = vmatpush3.msk.msra.mxu0 %vm444_vm0, %v1562_v14 }
 0x174   : > { %1190 = vmatmul.mubr.f32.vlgmr.msra.gmra.mxu0 %v521_v9  ;;  %1197 = vmatprep.subr.mxu0 %v1560_v10  ;;  %v559_v15 = vsub.f32 %v1164_v12, %v1164_v12 }
 0x175   : > { %1199 = vmatprep.mubr.msk.f32.mxu0 %vm1561_vm3, %v1560_v10 }
 0x176   : > { %1198 = vmatpush3.msra.mxu0 %v559_v15  ;;  %v560_v17 = vand.u32 4294901760, %v559_v15 }
 0x177   : > { %1207 = vmatprep.subr.mxu0 %v1560_v10 }
 0x178   : > { %1200 = vmatmul.mubr.f32.vlgmr.msra.gmra.mxu0 %v518_v0  ;;  %v561_v18 = vsub.f32 %v559_v15, %v560_v17 }
 0x179   : > { %1208 = vmatpush3.msra.mxu0 %v560_v17  ;;  %1209 = vmatprep.mubr.msk.f32.mxu0 %vm1561_vm3, %v1560_v10 }
 0x17a   : > { %v562_v19 = vand.u32 4294901760, %v561_v18 }
 0x17c   : > { %1193 = vmatpush3.msra.mxu1 %v562_v19  ;;  %1210 = vmatmul.mubr.f32.vlgmr.msra.gmra.mxu0 %v517_v62 }
 0x17d   : > { %1195 = vmatmul.mubr.f32.vlgmr.msra.gmra.mxu1 %v517_v62  ;;  %1202 = vmatprep.subr.mxu1 %v1560_v10 }
 0x17e   : > { %1203 = vmatpush3.msk.msra.mxu1 %vm444_vm0, %v1562_v14  ;;  %1204 = vmatprep.mubr.msk.f32.mxu1 %vm1561_vm3, %v1560_v10 }
 0x17f   : > { %1212 = vmatprep.subr.mxu1 %v1560_v10 }
 0x181   : > { %1205 = vmatmul.mubr.f32.vlgmr.msra.gmra.mxu1 %v519_v3 }
 0x182   : > { %1213 = vmatpush3.msk.msra.mxu1 %vm444_vm0, %v1562_v14  ;;  %1214 = vmatprep.mubr.msk.f32.mxu1 %vm1561_vm3, %v1560_v10 }
 0x185   : > { %1215 = vmatmul.mubr.f32.vlgmr.msra.gmra.mxu1 %v517_v62 }
 0x234   : > { %v523_v20 = vpop.f32.mrf.mxu0 }
 0x236   : > { %v1191_v21 = vpop.f32.mrf.mxu0 }
 0x238   : > { %v673_v22 = vpop.f32.mrf.mxu0 }
 0x23a   : > { %v1201_v23 = vpop.f32.mrf.mxu0 }
 0x23c   : > { %v821_v24 = vpop.f32.mrf.mxu0 }
 0x23d   : > { %v599_v25 = vpop.f32.mrf.mxu1 }
 0x23e   : > { %v600_v26 = vadd.f32 %v599_v25, %v523_v20  ;;  %v1211_v27 = vpop.f32.mrf.mxu0 }
 0x23f   : > { %v1196_v28 = vpop.f32.mrf.mxu1 }
 0x240   : > { %v674_v29 = vadd.f32 %v673_v22, %v600_v26 }
 0x241   : > { %v747_v30 = vpop.f32.mrf.mxu1 }
 0x242   : > { %v748_v31 = vadd.f32 %v747_v30, %v674_v29 }
 0x243   : > { %v1206_v13 = vpop.f32.mrf.mxu1 }
 0x244   : > { %v822_v32 = vadd.f32 %v821_v24, %v748_v31 }
 0x245   : > { %v893_v10 = vpop.f32.mrf.mxu1 }
 0x246   : > { %v894_v34 = vadd.f32 %v893_v10, %v822_v32 }
 0x247   : > { %v1216_v35 = vpop.f32.mrf.mxu1 }
 0x248   : > { %v907_v36 = vrot.slane %v894_v34, 4  ;;  %v912_v37 = vrot.slane %v894_v34, 2  ;;  %v897_v38 = vsub.f32 %v1751_v16, %v894_v34  ;;  %v903_v39 = vsub.f32 %v894_v34, %v901_v33 }
 0x249   : > { %v917_v40 = vadd.f32 0.5, %v894_v34 }
 0x24a   : > { %898 = vst [vmem:[%s321_s9] sm:$0x3] %v897_v38   ;;  %904 = vst [vmem:[%s321_s9] sm:$0xc] %v903_v39   ;;  %v909_v41 = vsub.f32 %v894_v34, %v907_v36  ;;  %v914_v42 = vsub.f32 %v894_v34, %v912_v37 }
 0x24b   : > { %1421 = shalt.err (!%p1418_p0)
}
 0x24c   : > { %s1422_s25 = scalar_lea.hbm %s1800_s12, 64  ;;  %s1426_s27 = scalar_lea.hbm %s1914_s4, 128 }
 0x24d   : > { %p1423_p10 = scmp.ne.s32.totalorder %s1800_s12, %s1422_s25  ;;  %p1427_p7 = scmp.lt.s32.totalorder %s1800_s12, %s1914_s4 }
 0x24e   : > { %p1428_p1 = scmp.lt.s32.totalorder %s1426_s27, %s1422_s25 }
 0x24f   : > { %p1424_p3 = pnand %p1423_p10, %p1932_p13 }
 0x250   : > { %p1429_p11 = por %p1428_p1, %p1427_p7 }
 0x251   : > { %p1425_p5 = pneg %p1424_p3 }
 0x253   : > { %p1430_p12 = pnand %p1429_p11, %p1425_p5 }
 0x255   : > { %1433 = shalt.err (!%p1430_p12)
}
 0x256   : > { %1230 = dma.vmem_to_hbm [thread:$0]  (%p1932_p13), %s1802_s6, 64, %s1800_s12, %s1813_s8   ;;  %v1219_v43 = vtrunc.f32 %v917_v40  ;;  %910 = vst [vmem:[%s1793_s10 - $0x4] sm:$0x30] %v909_v41   ;;  %915 = vst [vmem:[%s1793_s10] sm:$0xc] %v914_v42  }
 0x257   : > { %s1434_s0 = scalar_lea.vmem %s1809_s26, 64  ;;  %s1564_s14 = smov [#allocation11]  }
 0x258   : > { %v1220_v44 = vcvt.f32.s32 %v1219_v43  ;;  %p1435_p2 = scmp.ne.s32.totalorder %s1809_s26, %s1434_s0  ;;  %s1438_s16 = sshll.u32 %s1564_s14, 4  ;;  %s1439_s16 = int_to_ptr.vmem [resolvable:$false] %s1438_s16 }
 0x259   : > { %s1440_s29 = scalar_lea.vmem %s1439_s16, 128  ;;  %p1441_p4 = scmp.lt.s32.totalorder %s1809_s26, %s1439_s16 }
 0x25a   : > { %p1436_p9 = pnand %p1435_p2, %p1932_p13  ;;  %p1442_p6 = scmp.lt.s32.totalorder %s1440_s29, %s1434_s0 }
 0x25c   : > { %p1437_p8 = pneg %p1436_p9  ;;  %p1443_p0 = por %p1442_p6, %p1441_p4 }
 0x25e   : > { %p1444_p10 = pnand %p1443_p0, %p1437_p8 }
 0x260   : > { %1447 = shalt.err (!%p1444_p10)
}
 0x261   : > { %s1448_s6 = scalar_lea.hbm %s1807_s17, 64  ;;  %s1452_s25 = scalar_lea.hbm %s1915_s5, 128 }
 0x262   : > { %p1449_p3 = scmp.ne.s32.totalorder %s1807_s17, %s1448_s6  ;;  %p1453_p1 = scmp.lt.s32.totalorder %s1807_s17, %s1915_s5 }
 0x263   : > { %p1454_p11 = scmp.lt.s32.totalorder %s1452_s25, %s1448_s6 }
 0x264   : > { %p1450_p5 = pnand %p1449_p3, %p1932_p13 }
 0x265   : > { %p1455_p12 = por %p1454_p11, %p1453_p1 }
 0x266   : > { %p1451_p7 = pneg %p1450_p5 }
 0x268   : > { %p1456_p2 = pnand %p1455_p12, %p1451_p7 }
 0x26a   : > { %1459 = shalt.err (!%p1456_p2)
}
 0x26b   : > { %1231 = dma.vmem_to_hbm [thread:$0]  (%p1932_p13), %s1809_s26, 64, %s1807_s17, %s1813_s8   ;;  %vm919_vm1 = vcmp.eq.f32.partialorder %v1764_v63, 1e+08  ;;  %vm921_vm2 = vcmp.gt.f32.partialorder %v1751_v16, 0.0 }
 0x26c   : > { %s1170_s27 = sshll.u32 %s1540_s21, 4  ;;  %s314_s15 = scalar_lea.vmem [#allocation8], %s1731_s11  ;;  %v920_v45 = vsel %vm919_vm1, 0, %v1220_v44 }
 0x26d   : > { %s949_s0 = sshll.u32 %s314_s15, 4  ;;  %v922_v46 = vrot.slane %v920_v45, 1  ;;  %s1866_s29 = scalar_lea.hbm %s1913_s3, %s1170_s27  ;;  %s950_s0 = int_to_ptr.vmem [resolvable:$true] %s949_s0 }
 0x26e   : > { %s926_s6 = scalar_lea.sflag [#allocation4], %s1731_s11  ;;  %s1460_s10 = scalar_lea.vmem %s950_s0, 16 }
 0x26f   : > { %v923_v47 = vsel %vm921_vm2, %v922_v46, 4294967295  ;;  %p1461_p9 = scmp.ne.s32.totalorder %s950_s0, %s1460_s10  ;;  %s1565_s21 = smov [#allocation8]  }
 0x270   : > { %924 = vst [vmem:[%s314_s15 - $0x5] sm:$0x20] %v923_v47  ;;  %s1464_s26 = sshll.u32 %s1565_s21, 4  ;;  %s1465_s26 = int_to_ptr.vmem [resolvable:$false] %s1464_s26 }
 0x271   : > { %p1462_p8 = pnand %p1461_p9, %p1932_p13  ;;  %s1466_s17 = scalar_lea.vmem %s1465_s26, 32 }
 0x272   : > { %p1467_p6 = scmp.lt.s32.totalorder %s950_s0, %s1465_s26  ;;  %p1468_p0 = scmp.lt.s32.totalorder %s1466_s17, %s1460_s10 }
 0x273   : > { %p1463_p4 = pneg %p1462_p8 }
 0x274   : > { %p1469_p10 = por %p1468_p0, %p1467_p6 }
 0x276   : > { %p1470_p3 = pnand %p1469_p10, %p1463_p4 }
 0x278   : > { %1473 = shalt.err (!%p1470_p3)
}
 0x279   : > { %s1474_s8 = scalar_lea.hbm %s1866_s29, 16  ;;  %s1478_s25 = scalar_lea.hbm %s1913_s3, 32 }
 0x27a   : > { %p1475_p5 = scmp.ne.s32.totalorder %s1866_s29, %s1474_s8  ;;  %p1479_p11 = scmp.lt.s32.totalorder %s1866_s29, %s1913_s3 }
 0x27b   : > { %p1480_p12 = scmp.lt.s32.totalorder %s1478_s25, %s1474_s8 }
 0x27c   : > { %p1476_p7 = pnand %p1475_p5, %p1932_p13 }
 0x27d   : > { %p1481_p2 = por %p1480_p12, %p1479_p11 }
 0x27e   : > { %p1477_p1 = pneg %p1476_p7 }
 0x280   : > { %p1482_p9 = pnand %p1481_p2, %p1477_p1 }
 0x282   : > { %1485 = shalt.err (!%p1482_p9)
}
 0x283   : > { %1229 = dma.vmem_to_hbm [thread:$0]  (%p1932_p13), %s950_s0, 16, %s1866_s29, %s926_s6  }
 0x284 PF: > { %s989_s27 = sand.u32 1, %s1528_s18   ;;  %p1933_p8 = scmp.ne.s32.totalorder %s1924_s7, 0 }
 0x285   : > { %p1934_p4 = scmp.ge.s32.totalorder %s1548_s23, 2  ;;  %s990_s15 = scalar_lea.sflag [#allocation4], %s989_s27 }
 0x287   : > { %p1247_p6 = pnand %p1934_p4, %p1933_p8 }
 0x289   : > { %p1248_p0 = pneg %p1247_p6 }
 0x28b   : > { %1519 = dma.done.wait (%p1248_p0), %s990_s15, 16  }
 0x28c   : > { %1521 = vsyncadd (%p1248_p0), %s990_s15, 4294967280  ;;  %s1935_s14 = sadd.s32 4294967294, %s1548_s23  }
 0x28d   : > { %s997_s16 = sand.u32 1, %s1935_s14  }
 0x28e   : > { %s998_s10 = scalar_lea.sflag [#allocation10], %s997_s16 }
 0x28f   : > { %1523 = dma.done.wait (%p1248_p0), %s998_s10, 128  }
 0x290   : > { %1525 = vsyncadd (%p1248_p0), %s998_s10, 4294967168  ;;  %s26_s23 = sadd.s32 1, %s1548_s23   ;;  %s1936_s18 = smov %s1532_s19 }
 0x291   : > { %p23_p13 = scmp.ge.s32.totalorder %s26_s23, 4   ;;  %s1937_s19 = smov %s1536_s20 }
 0x292   : > { %s1938_s20 = smov %s1644_s30  ;;  %s1939_s21 = smov %s1544_s22 }
 0x293   : > { %s1940_s22 = smov %s1942_s24  ;;  %25 = sbr.rel (!%p23_p13) target bundleno = 11 (0xb), region = 126 }
 0x298   :  { %1012 = vsyncpa [#allocation3], 1 }
 0x299   :  { %1014 = vsyncpa [#allocation3 + $0x1], 1 }
 0x29a   :  { %1015 = vsyncpa [#allocation6], 1 }
 0x29b   :  { %1017 = vsyncpa [#allocation6 + $0x1], 1 }
 0x29c   :  { %1018 = vsyncpa [#allocation4], 1 }
 0x29d   :  { %1020 = vsyncpa [#allocation4 + $0x1], 1 }
 0x29e   :  { %1021 = vsyncpa [#allocation10], 1 }
 0x29f   :  { %1023 = vsyncpa [#allocation10 + $0x1], 1 }

</bundles_post_ra>
